<compile_context>
chip_gen: v7x
topology: tpu7x:2x2x1
jax: 0.10.0
libtpu: 0.0.40
codegen_flags: <defaults>
</compile_context>

<pallas_src>
import functools

import jax
import jax.numpy as jnp
from jax import lax
from jax.experimental import pallas as pl
from jax.experimental.pallas import tpu as pltpu

_SUB = 8      # sublane chunk: one f32 vreg row-group; bounds live vregs/chunk
_LANES = 128  # lane width


def _rot_rows(roll, pitch, yaw):
    """Entries of R = Rz @ Ry @ Rx (matches the PyTorch module), elementwise."""
    cr, sr = jnp.cos(roll), jnp.sin(roll)
    cp, sp = jnp.cos(pitch), jnp.sin(pitch)
    cy, sy = jnp.cos(yaw), jnp.sin(yaw)
    spsr = sp * sr
    spcr = sp * cr
    return (
        cy * cp, cy * spsr - sy * cr, cy * spcr + sy * sr,
        sy * cp, sy * spsr + cy * cr, sy * spcr - cy * sr,
        -sp, cp * sr, cp * cr,
    )


def _pair_partial(p1, p2):
    """||R1-R2||_F^2 + ||t1-t2||^2 for a (6, s, 128) chunk pair -> (s, 128)."""
    r1 = _rot_rows(p1[3], p1[4], p1[5])
    r2 = _rot_rows(p2[3], p2[4], p2[5])
    partial = jnp.zeros_like(p1[0])
    for a, b in zip(r1, r2):
        d = a - b
        partial = partial + d * d
    for k in range(3):
        dt = p1[k] - p2[k]
        partial = partial + dt * dt
    return partial


def _cubic_loss_kernel(out_ref, tgt_ref, o_ref, *, n_sub):
    """One batch tile.

    out_ref, tgt_ref : (6, tm, 128) f32 -- params, batch dense on sublanes+lanes
    o_ref            : (8, 128)     f32 -- per-tile partial sums (lane-dense)
    """
    def chunk(c, acc):
        r = pl.multiple_of(c * _SUB, _SUB)
        p1 = out_ref[:, pl.ds(r, _SUB), :]   # (6, 8, 128)
        p2 = tgt_ref[:, pl.ds(r, _SUB), :]
        return acc + _pair_partial(p1, p2)

    # Not unrolled: each chunk is ~500 VALU ops of ILP already, and keeping the
    # loop visible bounds live vreg ranges to one chunk (~30 vregs) -> no spill.
    acc = lax.fori_loop(0, n_sub, chunk, jnp.zeros((_SUB, _LANES), jnp.float32))
    o_ref[...] = acc


def _cubic_loss_closed_form(output, target):
    """Plain-JAX fast path (same closed-form identity), for small batches."""
    def rot(p):
        return jnp.stack(_rot_rows(p[:, 3], p[:, 4], p[:, 5]), axis=-1)  # (B, 9)
    dR = rot(output) - rot(target)
    dt = output[:, :3] - target[:, :3]
    return 8.0 * (jnp.sum(dR * dR) + jnp.sum(dt * dt)) / output.shape[0]


def cubic_loss_pallas(output, target, *, tm=256, min_pallas_batch=512,
                      force_pallas=False):
    """Pallas equivalent of cubic_loss.forward(output, target) -> scalar."""
    output = jnp.asarray(output, jnp.float32)
    target = jnp.asarray(target, jnp.float32)
    batch = output.shape[0]

    if batch < min_pallas_batch and not force_pallas:
        # Tiny batches: kernel launch + padding waste dominate; stay in XLA.
        return _cubic_loss_closed_form(output, target)

    tm = max(_SUB, (tm // _SUB) * _SUB)            # tm must be a sublane multiple
    rows = pl.cdiv(batch, _LANES)                  # sublane rows needed
    tm_eff = min(tm, pl.cdiv(rows, _SUB) * _SUB)   # clamp tile for small B
    n_tiles = pl.cdiv(rows, tm_eff)
    rows_pad = n_tiles * tm_eff
    b_pad = rows_pad * _LANES

    # Lane+sublane dense layout: (B, 6) -> (6, B) -> (6, rows_pad, 128).
    # NOTE: for very large B, callers can pass pre-transposed (6, B) data to
    # avoid this extra HBM pass; at module-typical sizes it is noise.
    p1 = output.T
    p2 = target.T
    if b_pad != batch:
        pad = b_pad - batch
        # Padded columns are zero in BOTH inputs -> dR = dt = 0 -> contribute 0.
        p1 = jnp.pad(p1, ((0, 0), (0, pad)))
        p2 = jnp.pad(p2, ((0, 0), (0, pad)))
    p1 = p1.reshape(6, rows_pad, _LANES)
    p2 = p2.reshape(6, rows_pad, _LANES)

    kernel = functools.partial(_cubic_loss_kernel, n_sub=tm_eff // _SUB)

    partials = pl.pallas_call(
        kernel,
        out_shape=jax.ShapeDtypeStruct((n_tiles * _SUB, _LANES), jnp.float32),
        grid_spec=pltpu.PrefetchScalarGridSpec(
            num_scalar_prefetch=0,
            grid=(n_tiles,),
            in_specs=[
                pl.BlockSpec((6, tm_eff, _LANES), lambda i: (0, i, 0)),
                pl.BlockSpec((6, tm_eff, _LANES), lambda i: (0, i, 0)),
            ],
            out_specs=pl.BlockSpec((_SUB, _LANES), lambda i: (i, 0)),
        ),
        compiler_params=pltpu.CompilerParams(
            # Independent per-tile partial sums -> parallel (uses both TCs on v7x).
            dimension_semantics=("parallel",),
        ),
    )(p1, p2)

    # Closed-form corner sum: factor 8 from sum_j v_j v_j^T = 8*I over the cube.
    return jnp.sum(partials) * (8.0 / batch)


def _cubic_loss_ref(output, target):
    """Pure-JAX reference mirroring the PyTorch module exactly (explicit corners)."""
    verts = jnp.array(
        [[-1, -1, 1], [-1, 1, 1], [1, 1, 1], [1, -1, 1],
         [-1, -1, -1], [-1, 1, -1], [1, 1, -1], [1, -1, -1]],
        dtype=jnp.float32)                        # (8, 3)

    def transform(p):
        t, r = p[:, :3], p[:, 3:6]
        cr, sr = jnp.cos(r[:, 0]), jnp.sin(r[:, 0])
        cp, sp = jnp.cos(r[:, 1]), jnp.sin(r[:, 1])
        cy, sy = jnp.cos(r[:, 2]), jnp.sin(r[:, 2])
        R = jnp.stack([
            jnp.stack([cy * cp, cy * sp * sr - sy * cr, cy * sp * cr + sy * sr], -1),
            jnp.stack([sy * cp, sy * sp * sr + cy * cr, sy * sp * cr - cy * sr], -1),
            jnp.stack([-sp, cp * sr, cp * cr], -1),
        ], axis=1)                                # (B, 3, 3)
        return jnp.einsum('bij,vj->bvi', R, verts) + t[:, None, :]

    d = transform(output) - transform(target)
    return jnp.sum(d * d) / output.shape[0]


if __name__ == "__main__":
    key = jax.random.PRNGKey(0)
    k1, k2, k3, k4 = jax.random.split(key, 4)

    # Small shape consistent with the module: batch=2, 6 pose params.
    B = 2
    output = jax.random.normal(k1, (B, 6), dtype=jnp.float32)
    target = jax.random.normal(k2, (B, 6), dtype=jnp.float32)
    ref = _cubic_loss_ref(output, target)

    # Force the Pallas path even at the tiny module-scale batch.
    loss = jax.block_until_ready(cubic_loss_pallas(output, target, force_pallas=True))
    assert jnp.allclose(loss, ref, rtol=1e-4, atol=1e-4), (loss, ref)

    # Default path (plain-JAX fast path kicks in for tiny batches).
    loss_fast = jax.block_until_ready(cubic_loss_pallas(output, target))
    assert jnp.allclose(loss_fast, ref, rtol=1e-4, atol=1e-4), (loss_fast, ref)

    # Exercise the multi-tile parallel grid + per-tile partial outputs + padding.
    B2 = 3000
    output2 = jax.random.normal(k3, (B2, 6), dtype=jnp.float32)
    target2 = jax.random.normal(k4, (B2, 6), dtype=jnp.float32)
    loss2 = jax.block_until_ready(
        cubic_loss_pallas(output2, target2, tm=8, force_pallas=True))
    ref2 = _cubic_loss_ref(output2, target2)
    assert jnp.allclose(loss2, ref2, rtol=1e-4, atol=1e-4), (loss2, ref2)

    print("KERNEL_OK")
</pallas_src>

<mosaic_0001>
module attributes {stable_mosaic.version = 11 : i64} {
  func.func @_cubic_loss_kernel(%arg0: i32, %arg1: memref<6x8x128xf32, #tpu.memory_space<vmem>>, %arg2: memref<6x8x128xf32, #tpu.memory_space<vmem>>, %arg3: memref<8x128xf32, #tpu.memory_space<vmem>>) attributes {dimension_semantics = [#tpu.dimension_semantics<parallel>], iteration_bounds = array<i64: 1>, scalar_prefetch = 0 : i64, scratch_operands = 0 : i64, tpu.core_type = #tpu.core_type<tc>, window_params = [{transform_indices = @transform_0, window_bounds = array<i64: 6, 8, 128>}, {transform_indices = @transform_1, window_bounds = array<i64: 6, 8, 128>}, {transform_indices = @transform_2, window_bounds = array<i64: 8, 128>}]} {
    %cst = arith.constant 0.000000e+00 : f32
    %0 = vector.broadcast %cst : f32 to vector<8x128xf32>
    %c0_i32 = arith.constant 0 : i32
    %c8_i32 = arith.constant 8 : i32
    %1 = arith.muli %c0_i32, %c8_i32 : i32
    %2 = tpu.assume_multiple %1, 8 : i32
    %c0 = arith.constant 0 : index
    %3 = arith.index_cast %2 : i32 to index
    %c0_0 = arith.constant 0 : index
    %4 = vector.load %arg1[%c0, %3, %c0_0] : memref<6x8x128xf32, #tpu.memory_space<vmem>>, vector<6x8x128xf32>
    %c0_1 = arith.constant 0 : index
    %5 = arith.index_cast %2 : i32 to index
    %c0_2 = arith.constant 0 : index
    %6 = vector.load %arg2[%c0_1, %5, %c0_2] : memref<6x8x128xf32, #tpu.memory_space<vmem>>, vector<6x8x128xf32>
    %7 = vector.extract_strided_slice %4 {offsets = [3, 0, 0], sizes = [1, 8, 128], strides = [1, 1, 1]} : vector<6x8x128xf32> to vector<1x8x128xf32>
    %8 = vector.shape_cast %7 : vector<1x8x128xf32> to vector<8x128xf32>
    %9 = vector.extract_strided_slice %4 {offsets = [4, 0, 0], sizes = [1, 8, 128], strides = [1, 1, 1]} : vector<6x8x128xf32> to vector<1x8x128xf32>
    %10 = vector.shape_cast %9 : vector<1x8x128xf32> to vector<8x128xf32>
    %11 = vector.extract_strided_slice %4 {offsets = [5, 0, 0], sizes = [1, 8, 128], strides = [1, 1, 1]} : vector<6x8x128xf32> to vector<1x8x128xf32>
    %12 = vector.shape_cast %11 : vector<1x8x128xf32> to vector<8x128xf32>
    %13 = math.cos %8 : vector<8x128xf32>
    %14 = math.sin %8 : vector<8x128xf32>
    %15 = math.cos %10 : vector<8x128xf32>
    %16 = math.sin %10 : vector<8x128xf32>
    %17 = math.cos %12 : vector<8x128xf32>
    %18 = math.sin %12 : vector<8x128xf32>
    %19 = arith.mulf %16, %14 : vector<8x128xf32>
    %20 = arith.mulf %16, %13 : vector<8x128xf32>
    %21 = arith.mulf %17, %15 : vector<8x128xf32>
    %22 = arith.mulf %17, %19 : vector<8x128xf32>
    %23 = arith.mulf %18, %13 : vector<8x128xf32>
    %24 = arith.subf %22, %23 : vector<8x128xf32>
    %25 = arith.mulf %17, %20 : vector<8x128xf32>
    %26 = arith.mulf %18, %14 : vector<8x128xf32>
    %27 = arith.addf %25, %26 : vector<8x128xf32>
    %28 = arith.mulf %18, %15 : vector<8x128xf32>
    %29 = arith.mulf %18, %19 : vector<8x128xf32>
    %30 = arith.mulf %17, %13 : vector<8x128xf32>
    %31 = arith.addf %29, %30 : vector<8x128xf32>
    %32 = arith.mulf %18, %20 : vector<8x128xf32>
    %33 = arith.mulf %17, %14 : vector<8x128xf32>
    %34 = arith.subf %32, %33 : vector<8x128xf32>
    %cst_3 = arith.constant 0.000000e+00 : f32
    %35 = vector.broadcast %cst_3 : f32 to vector<8x128xf32>
    %36 = arith.subf %35, %16 : vector<8x128xf32>
    %37 = arith.mulf %15, %14 : vector<8x128xf32>
    %38 = arith.mulf %15, %13 : vector<8x128xf32>
    %39 = vector.extract_strided_slice %6 {offsets = [3, 0, 0], sizes = [1, 8, 128], strides = [1, 1, 1]} : vector<6x8x128xf32> to vector<1x8x128xf32>
    %40 = vector.shape_cast %39 : vector<1x8x128xf32> to vector<8x128xf32>
    %41 = vector.extract_strided_slice %6 {offsets = [4, 0, 0], sizes = [1, 8, 128], strides = [1, 1, 1]} : vector<6x8x128xf32> to vector<1x8x128xf32>
    %42 = vector.shape_cast %41 : vector<1x8x128xf32> to vector<8x128xf32>
    %43 = vector.extract_strided_slice %6 {offsets = [5, 0, 0], sizes = [1, 8, 128], strides = [1, 1, 1]} : vector<6x8x128xf32> to vector<1x8x128xf32>
    %44 = vector.shape_cast %43 : vector<1x8x128xf32> to vector<8x128xf32>
    %45 = math.cos %40 : vector<8x128xf32>
    %46 = math.sin %40 : vector<8x128xf32>
    %47 = math.cos %42 : vector<8x128xf32>
    %48 = math.sin %42 : vector<8x128xf32>
    %49 = math.cos %44 : vector<8x128xf32>
    %50 = math.sin %44 : vector<8x128xf32>
    %51 = arith.mulf %48, %46 : vector<8x128xf32>
    %52 = arith.mulf %48, %45 : vector<8x128xf32>
    %53 = arith.mulf %49, %47 : vector<8x128xf32>
    %54 = arith.mulf %49, %51 : vector<8x128xf32>
    %55 = arith.mulf %50, %45 : vector<8x128xf32>
    %56 = arith.subf %54, %55 : vector<8x128xf32>
    %57 = arith.mulf %49, %52 : vector<8x128xf32>
    %58 = arith.mulf %50, %46 : vector<8x128xf32>
    %59 = arith.addf %57, %58 : vector<8x128xf32>
    %60 = arith.mulf %50, %47 : vector<8x128xf32>
    %61 = arith.mulf %50, %51 : vector<8x128xf32>
    %62 = arith.mulf %49, %45 : vector<8x128xf32>
    %63 = arith.addf %61, %62 : vector<8x128xf32>
    %64 = arith.mulf %50, %52 : vector<8x128xf32>
    %65 = arith.mulf %49, %46 : vector<8x128xf32>
    %66 = arith.subf %64, %65 : vector<8x128xf32>
    %cst_4 = arith.constant 0.000000e+00 : f32
    %67 = vector.broadcast %cst_4 : f32 to vector<8x128xf32>
    %68 = arith.subf %67, %48 : vector<8x128xf32>
    %69 = arith.mulf %47, %46 : vector<8x128xf32>
    %70 = arith.mulf %47, %45 : vector<8x128xf32>
    %cst_5 = arith.constant 0.000000e+00 : f32
    %71 = vector.broadcast %cst_5 : f32 to vector<8x128xf32>
    %72 = arith.subf %21, %53 : vector<8x128xf32>
    %73 = arith.mulf %72, %72 : vector<8x128xf32>
    %74 = arith.addf %71, %73 : vector<8x128xf32>
    %75 = arith.subf %24, %56 : vector<8x128xf32>
    %76 = arith.mulf %75, %75 : vector<8x128xf32>
    %77 = arith.addf %74, %76 : vector<8x128xf32>
    %78 = arith.subf %27, %59 : vector<8x128xf32>
    %79 = arith.mulf %78, %78 : vector<8x128xf32>
    %80 = arith.addf %77, %79 : vector<8x128xf32>
    %81 = arith.subf %28, %60 : vector<8x128xf32>
    %82 = arith.mulf %81, %81 : vector<8x128xf32>
    %83 = arith.addf %80, %82 : vector<8x128xf32>
    %84 = arith.subf %31, %63 : vector<8x128xf32>
    %85 = arith.mulf %84, %84 : vector<8x128xf32>
    %86 = arith.addf %83, %85 : vector<8x128xf32>
    %87 = arith.subf %34, %66 : vector<8x128xf32>
    %88 = arith.mulf %87, %87 : vector<8x128xf32>
    %89 = arith.addf %86, %88 : vector<8x128xf32>
    %90 = arith.subf %36, %68 : vector<8x128xf32>
    %91 = arith.mulf %90, %90 : vector<8x128xf32>
    %92 = arith.addf %89, %91 : vector<8x128xf32>
    %93 = arith.subf %37, %69 : vector<8x128xf32>
    %94 = arith.mulf %93, %93 : vector<8x128xf32>
    %95 = arith.addf %92, %94 : vector<8x128xf32>
    %96 = arith.subf %38, %70 : vector<8x128xf32>
    %97 = arith.mulf %96, %96 : vector<8x128xf32>
    %98 = arith.addf %95, %97 : vector<8x128xf32>
    %99 = vector.extract_strided_slice %4 {offsets = [0, 0, 0], sizes = [1, 8, 128], strides = [1, 1, 1]} : vector<6x8x128xf32> to vector<1x8x128xf32>
    %100 = vector.shape_cast %99 : vector<1x8x128xf32> to vector<8x128xf32>
    %101 = vector.extract_strided_slice %6 {offsets = [0, 0, 0], sizes = [1, 8, 128], strides = [1, 1, 1]} : vector<6x8x128xf32> to vector<1x8x128xf32>
    %102 = vector.shape_cast %101 : vector<1x8x128xf32> to vector<8x128xf32>
    %103 = arith.subf %100, %102 : vector<8x128xf32>
    %104 = arith.mulf %103, %103 : vector<8x128xf32>
    %105 = arith.addf %98, %104 : vector<8x128xf32>
    %106 = vector.extract_strided_slice %4 {offsets = [1, 0, 0], sizes = [1, 8, 128], strides = [1, 1, 1]} : vector<6x8x128xf32> to vector<1x8x128xf32>
    %107 = vector.shape_cast %106 : vector<1x8x128xf32> to vector<8x128xf32>
    %108 = vector.extract_strided_slice %6 {offsets = [1, 0, 0], sizes = [1, 8, 128], strides = [1, 1, 1]} : vector<6x8x128xf32> to vector<1x8x128xf32>
    %109 = vector.shape_cast %108 : vector<1x8x128xf32> to vector<8x128xf32>
    %110 = arith.subf %107, %109 : vector<8x128xf32>
    %111 = arith.mulf %110, %110 : vector<8x128xf32>
    %112 = arith.addf %105, %111 : vector<8x128xf32>
    %113 = vector.extract_strided_slice %4 {offsets = [2, 0, 0], sizes = [1, 8, 128], strides = [1, 1, 1]} : vector<6x8x128xf32> to vector<1x8x128xf32>
    %114 = vector.shape_cast %113 : vector<1x8x128xf32> to vector<8x128xf32>
    %115 = vector.extract_strided_slice %6 {offsets = [2, 0, 0], sizes = [1, 8, 128], strides = [1, 1, 1]} : vector<6x8x128xf32> to vector<1x8x128xf32>
    %116 = vector.shape_cast %115 : vector<1x8x128xf32> to vector<8x128xf32>
    %117 = arith.subf %114, %116 : vector<8x128xf32>
    %118 = arith.mulf %117, %117 : vector<8x128xf32>
    %119 = arith.addf %112, %118 : vector<8x128xf32>
    %120 = arith.addf %0, %119 : vector<8x128xf32>
    %c1_i32 = arith.constant 1 : i32
    %c0_6 = arith.constant 0 : index
    %c0_7 = arith.constant 0 : index
    %121 = vector.load %arg3[%c0_6, %c0_7] : memref<8x128xf32, #tpu.memory_space<vmem>>, vector<8x128xf32>
    tpu.vector_store %arg3[%c0_6, %c0_7], %120 {strides = array<i32>} : memref<8x128xf32, #tpu.memory_space<vmem>>, vector<8x128xf32>,
    return
  }
  func.func @transform_0(%arg0: i32) -> (i32, i32, i32) {
    %c0_i32 = arith.constant 0 : i32
    %c0_i32_0 = arith.constant 0 : i32
    %c0_i32_1 = arith.constant 0 : i32
    return %c0_i32, %arg0, %c0_i32_0 : i32, i32, i32
  }
  func.func @transform_1(%arg0: i32) -> (i32, i32, i32) {
    %c0_i32 = arith.constant 0 : i32
    %c0_i32_0 = arith.constant 0 : i32
    %c0_i32_1 = arith.constant 0 : i32
    return %c0_i32, %arg0, %c0_i32_0 : i32, i32, i32
  }
  func.func @transform_2(%arg0: i32) -> (i32, i32) {
    %c0_i32 = arith.constant 0 : i32
    %c0_i32_0 = arith.constant 0 : i32
    return %arg0, %c0_i32 : i32, i32
  }
}

</mosaic_0001>

<bundles_post_ra>
// kernel: tpu_custom_call.1
= control target key start
LH: loop header
LB: loop body
LE: loop exit
PB: predicated region body
PF: predicated region fallthrough
CT: control target
= control target key end

     0   :  { %7 = vsyncpa [#allocation3], 0  ;;  %s2248_s0 = inlined_call_operand.hbm [shape: f32[6,8,128], index: 0, kind: input, shape index: {}]   ;;  %s2249_s1 = inlined_call_operand.hbm [shape: f32[6,8,128], index: 1, kind: input, shape index: {}]   ;;  %s2250_s2 = inlined_call_operand.hbm [shape: f32[8,128], index: 2, kind: output, shape index: {}]  }
   0x1   :  { %8 = vsyncpa [#allocation6], 0 }
   0x2   :  { %9 = vsyncpa [#allocation4], 0  ;;  %s1568_s9 = smov [#allocation2]   ;;  %s1496_s13 = scalar_lea.hbm %s2248_s0, 768 }
   0x3   :  { %s15_s10 = sshll.u32 %s1568_s9, 4  ;;  %p1497_p0 = scmp.ne.s32.totalorder %s2248_s0, %s1496_s13  ;;  %s16_s10 = int_to_ptr.vmem [resolvable:$true] %s15_s10 }
   0x4   :  { %p1500_p1 = scmp.lt.u32.totalorder %s1496_s13, %s2248_s0 }
   0x6   :  { %p1502_p2 = pnand %p1500_p1, %p1497_p0 }
   0x8   :  { %1505 = shalt.err (!%p1502_p2)
}
   0x9   :  { %s1506_s18 = scalar_lea.vmem %s16_s10, 768  ;;  %p1511_p4 = scmp.lt.s32.totalorder %s16_s10, %s16_s10 }
   0xa   :  { %p1507_p3 = scmp.ne.s32.totalorder %s16_s10, %s1506_s18  ;;  %p1512_p5 = scmp.lt.s32.totalorder %s1506_s18, %s1506_s18 }
   0xc   :  { %p1513_p6 = por %p1512_p5, %p1511_p4 }
   0xe   :  { %p1514_p7 = pnand %p1513_p6, %p1507_p3 }
  0x10   :  { %1517 = shalt.err (!%p1514_p7)
}
  0x11   :  { %s1569_s19 = smov 128   ;;  %s1570_s20 = smov 8  }
  0x12   :  { %21 = dma.hbm_to_vmem [thread:$0]  %s2248_s0, 768, %s16_s10, [#allocation3], %s1569_s19, %s1569_s19, %s1570_s20  }
  0x13   :  { %s1571_s23 = smov [#allocation5]   ;;  %s1518_s27 = scalar_lea.hbm %s2249_s1, 768 }
  0x14   :  { %s27_s24 = sshll.u32 %s1571_s23, 4  ;;  %p1519_p8 = scmp.ne.s32.totalorder %s2249_s1, %s1518_s27  ;;  %s28_s24 = int_to_ptr.vmem [resolvable:$true] %s27_s24 }
  0x15   :  { %p1522_p9 = scmp.lt.u32.totalorder %s1518_s27, %s2249_s1 }
  0x17   :  { %p1524_p10 = pnand %p1522_p9, %p1519_p8 }
  0x19   :  { %1527 = shalt.err (!%p1524_p10)
}
  0x1a   :  { %s1528_s4 = scalar_lea.vmem %s28_s24, 768  ;;  %p1533_p12 = scmp.lt.s32.totalorder %s28_s24, %s28_s24 }
  0x1b   :  { %p1529_p11 = scmp.ne.s32.totalorder %s28_s24, %s1528_s4  ;;  %p1534_p13 = scmp.lt.s32.totalorder %s1528_s4, %s1528_s4 }
  0x1d   :  { %p1535_p0 = por %p1534_p13, %p1533_p12 }
  0x1f   :  { %p1536_p1 = pnand %p1535_p0, %p1529_p11 }
  0x21   :  { %1539 = shalt.err (!%p1536_p1)
}
  0x22   :  { %33 = dma.hbm_to_vmem [thread:$0]  %s2249_s1, 768, %s28_s24, [#allocation6], %s1569_s19, %s1569_s19, %s1570_s20  }
  0x23   :  { %1562 = dma.done.wait [#allocation3], 768  }
  0x24   :  { %1563 = vsyncadd [#allocation3], 4294966528 }
  0x25   :  { %1564 = dma.done.wait [#allocation6], 768  }
  0x26   :  { %1565 = vsyncadd [#allocation6], 4294966528  ;;  %v1618_v0 = vld [vmem:[#allocation2 + $0x18] sm:$0xff]  ;;  %v1620_v1 = vld [vmem:[#allocation2 + $0x20] sm:$0xff]  ;;  %v1572_v15 = vmov 2102212464  }
  0x27   :  { %v55_v2 = vand.u32 2139095040, %v1618_v0  ;;  %v262_v3 = vand.u32 2139095040, %v1620_v1  ;;  %v1624_v13 = vld [vmem:[#allocation2 + $0x28] sm:$0xff]  ;;  %v52_v14 = vand.u32 2147483647, %v1618_v0  ;;  %s1578_s1 = smov [#allocation7]  }
  0x28   :  { %v1573_v17 = vmov 920167782   ;;  %v469_v19 = vand.u32 2139095040, %v1624_v13  ;;  %v1574_v22 = vmov 1326507024   ;;  %s1376_s6 = sshll.u32 %s1578_s1, 4  ;;  %s1377_s6 = int_to_ptr.vmem [resolvable:$true] %s1376_s6 }
  0x29   :  { %v56_v4 = vshrl.u32 %v55_v2, 23  ;;  %v263_v5 = vshrl.u32 %v262_v3, 23  ;;  %v59_v25 = vand.u32 8388607, %v52_v14  ;;  %v1575_v26 = vmov 683565275   ;;  %p1545_p3 = scmp.lt.s32.totalorder %s1377_s6, %s1377_s6 }
  0x2a   :  { %v1576_v28 = vmov 2475754826   ;;  %v1577_v31 = vmov 2131351028   ;;  %v470_v38 = vshrl.u32 %v469_v19, 23  ;;  %s1540_s7 = scalar_lea.vmem %s1377_s6, 128 }
  0x2b   :  { %v1386_v6 = vadd.s32 4294967169, %v56_v4  ;;  %v1394_v8 = vadd.s32 4294967169, %v263_v5  ;;  %v60_v39 = vor.u32 8388608, %v59_v25  ;;  %v259_v47 = vand.u32 2147483647, %v1620_v1  ;;  %p1541_p2 = scmp.ne.s32.totalorder %s1377_s6, %s1540_s7  ;;  %p1546_p4 = scmp.lt.s32.totalorder %s1540_s7, %s1540_s7 }
  0x2c   :  { %v1402_v46 = vadd.s32 4294967169, %v470_v38 }
  0x2d   :  { %v62_v7 = vadd.s32 1, %v1386_v6  ;;  %v269_v11 = vadd.s32 1, %v1394_v8  ;;  %v1655_v50 = vshll.u32 %v60_v39, 8  ;;  %v266_v5 = vand.u32 8388607, %v259_v47  ;;  %p1547_p5 = por %p1546_p4, %p1545_p3 }
  0x2e   :  { %v476_v58 = vadd.s32 1, %v1402_v46 }
  0x2f   :  { %vm63_vm0 = vcmp.gt.s32.totalorder %v62_v7, 0  ;;  %vm270_vm1 = vcmp.gt.s32.totalorder %v269_v11, 0  ;;  %v267_v25 = vor.u32 8388608, %v266_v5  ;;  %p1548_p6 = pnand %p1547_p5, %p1541_p2 }
  0x30   :  { %v64_v9 = vsel %vm63_vm0, %v62_v7, 0  ;;  %v271_v24 = vsel %vm270_vm1, %v269_v11, 0  ;;  %vm477_vm7 = vcmp.gt.s32.totalorder %v476_v58, 0 }
  0x31   :  { %v66_v10 = vand.u32 31, %v64_v9  ;;  %v1630_v20 = vshrl.u32 %v64_v9, 5  ;;  %v273_v36 = vand.u32 31, %v271_v24  ;;  %v1663_v55 = vshrl.u32 %v271_v24, 5 }
  0x32   :  { %v307_v39 = vshll.u32 %v267_v25, 8 }
  0x33   :  { %v67_v12 = vsub.s32 32, %v66_v10  ;;  %v78_v16 = vshll.u32 %v1572_v15, %v66_v10  ;;  %v81_v21 = vshll.u32 %v1573_v17, %v66_v10  ;;  %v69_v27 = vshll.u32 %v1575_v26, %v66_v10 }
  0x34   :  { %v72_v29 = vshll.u32 %v1576_v28, %v66_v10  ;;  %v75_v33 = vshll.u32 %v1577_v31, %v66_v10  ;;  %vm87_vm2 = vcmp.lt.s32.totalorder %v1630_v20, 4  ;;  %vm84_vm3 = vcmp.lt.s32.totalorder %v1630_v20, 1 }
  0x35   :  { %v79_v18 = vshrl.u32 %v1573_v17, %v67_v12  ;;  %v82_v23 = vshrl.u32 %v1574_v22, %v67_v12  ;;  %v70_v30 = vshrl.u32 %v1576_v28, %v67_v12  ;;  %v73_v32 = vshrl.u32 %v1577_v31, %v67_v12 }
  0x36   :  { %v76_v34 = vshrl.u32 %v1572_v15, %v67_v12  ;;  %vm86_vm4 = vcmp.lt.s32.totalorder %v1630_v20, 3  ;;  %v274_v44 = vsub.s32 32, %v273_v36  ;;  %vm85_vm5 = vcmp.lt.s32.totalorder %v1630_v20, 2 }
  0x37   :  { %v80_v35 = vor.u32 %v79_v18, %v78_v16  ;;  %v83_v37 = vor.u32 %v82_v23, %v81_v21  ;;  %v71_v40 = vor.u32 %v70_v30, %v69_v27  ;;  %v74_v41 = vor.u32 %v73_v32, %v72_v29  ;;  %v1690_v18 = vld [vmem:[#allocation5 + $0x18] sm:$0xff] }
  0x38   :  { %v77_v42 = vor.u32 %v76_v34, %v75_v33  ;;  %v285_v53 = vshll.u32 %v1572_v15, %v273_v36  ;;  %v286_v54 = vshrl.u32 %v1573_v17, %v274_v44  ;;  %v288_v56 = vshll.u32 %v1573_v17, %v273_v36 }
  0x39   :  { %v93_v43 = vsel %vm87_vm2, %v80_v35, 920167782  ;;  %v97_v45 = vsel %vm87_vm2, %v83_v37, 1326507024  ;;  %v92_v48 = vsel %vm84_vm3, %v71_v40, %v74_v41  ;;  %v289_v57 = vshrl.u32 %v1574_v22, %v274_v44 }
  0x3a   :  { %v94_v49 = vsel %vm86_vm4, %v77_v42, %v93_v43  ;;  %v96_v51 = vsel %vm84_vm3, %v74_v41, %v77_v42  ;;  %v98_v52 = vsel %vm86_vm4, %v80_v35, %v97_v45  ;;  %v276_v60 = vshll.u32 %v1575_v26, %v273_v36 }
  0x3b   :  { %v95_v59 = vsel %vm85_vm5, %v92_v48, %v94_v49  ;;  %v277_v61 = vshrl.u32 %v1576_v28, %v274_v44  ;;  %v279_v62 = vshll.u32 %v1576_v28, %v273_v36  ;;  %v99_v63 = vsel %vm85_vm5, %v96_v51, %v98_v52 }
  0x3c   :  { %v280_v2 = vshrl.u32 %v1577_v31, %v274_v44  ;;  %v282_v3 = vshll.u32 %v1577_v31, %v273_v36  ;;  %v283_v4 = vshrl.u32 %v1572_v15, %v274_v44  ;;  %v287_v6 = vor.u32 %v286_v54, %v285_v53 }
  0x3d   :  { %v68_v7 = vshrl.u32 %v1575_v26, %v67_v12  ;;  %v290_v8 = vor.u32 %v289_v57, %v288_v56  ;;  %vm294_vm6 = vcmp.lt.s32.totalorder %v1663_v55, 4  ;;  %v278_v19 = vor.u32 %v277_v61, %v276_v60 }
  0x3e   :  { %v1682_v9 = vmul.u32.u64.low %v1655_v50, %v99_v63  ;;  %v1683_v10 = vmul.u32.u64.high %v1655_v50, %v99_v63, %v1682_v9  ;;  %v1686_v11 = vmul.u32.u64.low %v1655_v50, %v95_v59  ;;  %v1687_v16 = vmul.u32.u64.high %v1655_v50, %v95_v59, %v1686_v11 }
  0x3f   :  { %v281_v21 = vor.u32 %v280_v2, %v279_v62  ;;  %v284_v23 = vor.u32 %v283_v4, %v282_v3  ;;  %v89_v12 = vsel %vm87_vm2, %v77_v42, 2102212464  ;;  %vm291_vm8 = vcmp.lt.s32.totalorder %v1663_v55, 1 }
  0x40   :  { %vm293_vm9 = vcmp.lt.s32.totalorder %v1663_v55, 3  ;;  %v300_v24 = vsel %vm294_vm6, %v287_v6, 920167782  ;;  %v304_v27 = vsel %vm294_vm6, %v290_v8, 1326507024  ;;  %v478_v29 = vsel %vm477_vm7, %v476_v58, 0 }
  0x41   :  { %v88_v30 = vsel %vm84_vm3, %v68_v7, %v71_v40  ;;  %v695_v32 = vand.u32 2139095040, %v1690_v18  ;;  %v90_v33 = vsel %vm86_vm4, %v74_v41, %v89_v12  ;;  %vm292_vm10 = vcmp.lt.s32.totalorder %v1663_v55, 2 }
  0x42   :  { %v299_v34 = vsel %vm291_vm8, %v278_v19, %v281_v21  ;;  %v301_v35 = vsel %vm293_vm9, %v284_v23, %v300_v24  ;;  %v303_v36 = vsel %vm291_vm8, %v281_v21, %v284_v23  ;;  %v305_v37 = vsel %vm293_vm9, %v287_v6, %v304_v27 }
  0x43   :  { %v480_v38 = vand.u32 31, %v478_v29  ;;  %v91_v40 = vsel %vm85_vm5, %v88_v30, %v90_v33  ;;  %v110_v41 = vadd.s32 1, %v1687_v16  ;;  %v302_v42 = vsel %vm292_vm10, %v299_v34, %v301_v35 }
  0x44   :  { %v696_v43 = vshrl.u32 %v695_v32, 23  ;;  %vm109_vm11 = vc.u32 %v1683_v10, %v1686_v11  ;;  %v306_v45 = vsel %vm292_vm10, %v303_v36, %v305_v37  ;;  %v275_v46 = vshrl.u32 %v1575_v26, %v274_v44 }
  0x45   :  { %v481_v48 = vsub.s32 32, %v480_v38  ;;  %v107_v49 = vmul.u32 %v1655_v50, %v91_v40  ;;  %v1725_v51 = vmul.u32.u64.low %v307_v39, %v302_v42  ;;  %v1726_v20 = vmul.u32.u64.high %v307_v39, %v302_v42, %v1725_v51 }
  0x46   :  { %v111_v52 = vsel %vm109_vm11, %v110_v41, %v1687_v16  ;;  %v1730_v53 = vmul.u32.u64.low %v307_v39, %v306_v45  ;;  %v1731_v54 = vmul.u32.u64.high %v307_v39, %v306_v45, %v1730_v53  ;;  %v1410_v56 = vadd.s32 4294967169, %v696_v43 }
  0x47   :  { %v296_v57 = vsel %vm294_vm6, %v284_v23, 2102212464  ;;  %v295_v58 = vsel %vm291_vm8, %v275_v46, %v278_v19  ;;  %v466_v44 = vand.u32 2147483647, %v1624_v13  ;;  %v492_v50 = vshll.u32 %v1572_v15, %v480_v38 }
  0x48   :  { %v493_v59 = vshrl.u32 %v1573_v17, %v481_v48  ;;  %v112_v60 = vadd.s32 %v111_v52, %v107_v49  ;;  %v1740_v61 = vshrl.u32 %v478_v29, 5  ;;  %v495_v62 = vshll.u32 %v1573_v17, %v480_v38 }
  0x49   :  { %v496_v63 = vshrl.u32 %v1574_v22, %v481_v48  ;;  %v297_v2 = vsel %vm293_vm9, %v281_v21, %v296_v57  ;;  %v483_v3 = vshll.u32 %v1575_v26, %v480_v38  ;;  %v486_v4 = vshll.u32 %v1576_v28, %v480_v38 }
  0x4a   :  { %v702_v5 = vadd.s32 1, %v1410_v56  ;;  %v484_v6 = vshrl.u32 %v1576_v28, %v481_v48  ;;  %v487_v7 = vshrl.u32 %v1577_v31, %v481_v48  ;;  %v489_v8 = vshll.u32 %v1577_v31, %v480_v38 }
  0x4b   :  { %v490_v9 = vshrl.u32 %v1572_v15, %v481_v48  ;;  %v473_v16 = vand.u32 8388607, %v466_v44  ;;  %v494_v19 = vor.u32 %v493_v59, %v492_v50  ;;  %v298_v21 = vsel %vm292_vm10, %v295_v58, %v297_v2 }
  0x4c   :  { %v317_v23 = vadd.s32 1, %v1726_v20  ;;  %v497_v12 = vor.u32 %v496_v63, %v495_v62  ;;  %vm501_vm12 = vcmp.lt.s32.totalorder %v1740_v61, 4  ;;  %v113_v24 = vadd.s32 536870912, %v112_v60 }
  0x4d   :  { %vm316_vm13 = vc.u32 %v1731_v54, %v1725_v51  ;;  %v485_v25 = vor.u32 %v484_v6, %v483_v3  ;;  %v488_v27 = vor.u32 %v487_v7, %v486_v4  ;;  %v491_v29 = vor.u32 %v490_v9, %v489_v8 }
  0x4e   :  { %vm703_vm14 = vcmp.gt.s32.totalorder %v702_v5, 0  ;;  %v314_v30 = vmul.u32 %v307_v39, %v298_v21  ;;  %vm498_vm15 = vcmp.lt.s32.totalorder %v1740_v61, 1  ;;  %vm500_vm0 = vcmp.lt.s32.totalorder %v1740_v61, 3 }
  0x4f   :  { %v507_v55 = vsel %vm501_vm12, %v494_v19, 920167782  ;;  %v318_v32 = vsel %vm316_vm13, %v317_v23, %v1726_v20  ;;  %v474_v33 = vor.u32 8388608, %v473_v16  ;;  %v511_v34 = vsel %vm501_vm12, %v497_v12, 1326507024 }
  0x50   :  { %v1767_v35 = vshrl.u32 %v113_v24, 30  ;;  %v704_v36 = vsel %vm703_vm14, %v702_v5, 0  ;;  %vm499_vm1 = vcmp.lt.s32.totalorder %v1740_v61, 2  ;;  %v506_v37 = vsel %vm498_vm15, %v485_v25, %v488_v27 }
  0x51   :  { %v508_v38 = vsel %vm500_vm0, %v491_v29, %v507_v55  ;;  %v706_v39 = vand.u32 31, %v704_v36  ;;  %v319_v40 = vadd.s32 %v318_v32, %v314_v30  ;;  %v510_v41 = vsel %vm498_vm15, %v488_v27, %v491_v29 }
  0x52   :  { %v512_v42 = vsel %vm500_vm0, %v494_v19, %v511_v34  ;;  %v514_v43 = vshll.u32 %v474_v33, 8  ;;  %v509_v45 = vsel %vm499_vm1, %v506_v37, %v508_v38  ;;  %v115_v46 = vshll.u32 %v1767_v35, 30 }
  0x53   :  { %v513_v49 = vsel %vm499_vm1, %v510_v41, %v512_v42  ;;  %v692_v20 = vand.u32 2147483647, %v1690_v18  ;;  %v707_v52 = vsub.s32 32, %v706_v39  ;;  %v320_v53 = vadd.s32 536870912, %v319_v40 }
  0x54   :  { %v482_v56 = vshrl.u32 %v1575_v26, %v481_v48  ;;  %v503_v57 = vsel %vm501_vm12, %v491_v29, 2102212464  ;;  %v1787_v58 = vmul.u32.u64.low %v514_v43, %v509_v45  ;;  %v1788_v50 = vmul.u32.u64.high %v514_v43, %v509_v45, %v1787_v58 }
  0x55   :  { %v1791_v59 = vmul.u32.u64.low %v514_v43, %v513_v49  ;;  %v1792_v62 = vmul.u32.u64.high %v514_v43, %v513_v49, %v1791_v59  ;;  %v1794_v63 = vsub.s32 %v112_v60, %v115_v46  ;;  %v699_v2 = vand.u32 8388607, %v692_v20 }
  0x56   :  { %v718_v3 = vshll.u32 %v1572_v15, %v706_v39  ;;  %v719_v4 = vshrl.u32 %v1573_v17, %v707_v52  ;;  %v1800_v48 = vshrl.u32 %v320_v53, 30  ;;  %v502_v5 = vsel %vm498_vm15, %v482_v56, %v485_v25 }
  0x57   :  { %v504_v6 = vsel %vm500_vm0, %v488_v27, %v503_v57  ;;  %v705_v7 = vshrl.u32 %v704_v36, 5  ;;  %v709_v8 = vshll.u32 %v1575_v26, %v706_v39  ;;  %v710_v60 = vshrl.u32 %v1576_v28, %v707_v52 }
  0x58   :  { %v721_v9 = vshll.u32 %v1573_v17, %v706_v39  ;;  %v722_v16 = vshrl.u32 %v1574_v22, %v707_v52  ;;  %v712_v19 = vshll.u32 %v1576_v28, %v706_v39  ;;  %v713_v21 = vshrl.u32 %v1577_v31, %v707_v52 }
  0x59   :  { %v715_v23 = vshll.u32 %v1577_v31, %v706_v39  ;;  %v716_v12 = vshrl.u32 %v1572_v15, %v707_v52  ;;  %v720_v24 = vor.u32 %v719_v4, %v718_v3  ;;  %v118_v25 = vsub.s32 0, %v1794_v63 }
  0x5a   :  { %v322_v27 = vshll.u32 %v1800_v48, 30  ;;  %vm727_vm2 = vcmp.lt.s32.totalorder %v705_v7, 4  ;;  %v505_v29 = vsel %vm499_vm1, %v502_v5, %v504_v6  ;;  %v524_v30 = vadd.s32 1, %v1788_v50 }
  0x5b   :  { %v700_v55 = vor.u32 8388608, %v699_v2  ;;  %v723_v32 = vor.u32 %v722_v16, %v721_v9  ;;  %vm523_vm3 = vc.u32 %v1792_v62, %v1787_v58  ;;  %v711_v33 = vor.u32 %v710_v60, %v709_v8 }
  0x5c   :  { %v714_v34 = vor.u32 %v713_v21, %v712_v19  ;;  %v717_v36 = vor.u32 %v716_v12, %v715_v23  ;;  %vm724_vm4 = vcmp.lt.s32.totalorder %v705_v7, 1  ;;  %vm726_vm5 = vcmp.lt.s32.totalorder %v705_v7, 3 }
  0x5d   :  { %v733_v37 = vsel %vm727_vm2, %v720_v24, 920167782  ;;  %v1387_v38 = vmin.u32 %v118_v25, %v1794_v63  ;;  %v1823_v39 = vsub.s32 %v319_v40, %v322_v27  ;;  %v521_v61 = vmul.u32 %v514_v43, %v505_v29  ;;  %v1833_v43 = vld [vmem:[#allocation5 + $0x20] sm:$0xff] }
  0x5e   :  { %v525_v41 = vsel %vm523_vm3, %v524_v30, %v1788_v50  ;;  %v708_v42 = vshrl.u32 %v1575_v26, %v707_v52  ;;  %v737_v45 = vsel %vm727_vm2, %v723_v32, 1326507024  ;;  %v740_v46 = vshll.u32 %v700_v55, 8 }
  0x5f   :  { %vm725_vm6 = vcmp.lt.s32.totalorder %v705_v7, 2  ;;  %v732_v49 = vsel %vm724_vm4, %v711_v33, %v714_v34  ;;  %v734_v53 = vsel %vm726_vm5, %v717_v36, %v733_v37  ;;  %v736_v56 = vsel %vm724_vm4, %v714_v34, %v717_v36 }
  0x60   :  { %v729_v57 = vsel %vm727_vm2, %v717_v36, 2102212464  ;;  %v526_v59 = vadd.s32 %v525_v41, %v521_v61  ;;  %v738_v40 = vsel %vm726_vm5, %v720_v24, %v737_v45  ;;  %v120_v50 = vclz %v1387_v38 }
  0x61   :  { %v325_v52 = vsub.s32 0, %v1823_v39  ;;  %v735_v2 = vsel %vm725_vm6, %v732_v49, %v734_v53  ;;  %v739_v3 = vsel %vm725_vm6, %v736_v56, %v738_v40  ;;  %v728_v4 = vsel %vm724_vm4, %v708_v42, %v711_v33 }
  0x62   :  { %v730_v5 = vsel %vm726_vm5, %v714_v34, %v729_v57  ;;  %v1840_v6 = vmul.u32.u64.low %v740_v46, %v739_v3  ;;  %v1841_v8 = vmul.u32.u64.high %v740_v46, %v739_v3, %v1840_v6  ;;  %v527_v60 = vadd.s32 536870912, %v526_v59 }
  0x63   :  { %v1843_v9 = vmul.u32.u64.low %v740_v46, %v735_v2  ;;  %v1844_v16 = vmul.u32.u64.high %v740_v46, %v735_v2, %v1843_v9  ;;  %v902_v19 = vand.u32 2139095040, %v1833_v43  ;;  %v1388_v21 = vadd.s32 4294967294, %v120_v50 }
  0x64   :  { %v1395_v23 = vmin.u32 %v325_v52, %v1823_v39  ;;  %v731_v12 = vsel %vm725_vm6, %v728_v4, %v730_v5  ;;  %v1852_v25 = vshrl.u32 %v527_v60, 30  ;;  %v108_v49 = vadd.s32 %v1686_v11, %v1683_v10 }
  0x65   :  { %v903_v24 = vshrl.u32 %v902_v19, 23  ;;  %vm749_vm7 = vc.u32 %v1841_v8, %v1843_v9  ;;  %v747_v27 = vmul.u32 %v740_v46, %v731_v12  ;;  %v750_v29 = vadd.s32 1, %v1844_v16 }
  0x66   :  { %vm1389_vm8 = vcmp.lt.s32.totalorder %v1388_v21, 0  ;;  %v327_v55 = vclz %v1395_v23  ;;  %v529_v34 = vshll.u32 %v1852_v25, 30  ;;  %v315_v52 = vadd.s32 %v1725_v51, %v1731_v54  ;;  %v1877_v23 = vld [vmem:[#allocation5 + $0x28] sm:$0xff] }
  0x67   :  { %v1418_v30 = vadd.s32 4294967169, %v903_v24  ;;  %v751_v32 = vsel %vm749_vm7, %v750_v29, %v1844_v16  ;;  %v123_v33 = vsel %vm1389_vm8, 0, %v1388_v21  ;;  %vm54_vm3 = vcmp.lt.s32.totalorder %v1618_v0, 0 }
  0x68   :  { %v752_v36 = vadd.s32 %v751_v32, %v747_v27  ;;  %v1396_v37 = vadd.s32 4294967294, %v327_v55  ;;  %v128_v61 = vsub.s32 4294967266, %v123_v33  ;;  %v1857_v42 = vsub.s32 %v526_v59, %v529_v34 }
  0x69   :  { %v909_v7 = vadd.s32 1, %v1418_v30  ;;  %v124_v53 = vsub.s32 32, %v123_v33  ;;  %v899_v59 = vand.u32 2147483647, %v1833_v43  ;;  %v125_v3 = vshll.u32 %v1794_v63, %v123_v33 }
  0x6a   :  { %v753_v38 = vadd.s32 536870912, %v752_v36  ;;  %vm1397_vm10 = vcmp.lt.s32.totalorder %v1396_v37, 0  ;;  %v129_v56 = vadd.s32 127, %v128_v61  ;;  %v532_v40 = vsub.s32 0, %v1857_v42 }
  0x6b   :  { %vm910_vm9 = vcmp.gt.s32.totalorder %v909_v7, 0  ;;  %v330_v57 = vsel %vm1397_vm10, 0, %v1396_v37  ;;  %v126_v4 = vshrl.u32 %v108_v49, %v124_v53  ;;  %v906_v34 = vand.u32 8388607, %v899_v59 }
  0x6c   :  { %v911_v41 = vsel %vm910_vm9, %v909_v7, 0  ;;  %v1859_v46 = vshrl.u32 %v753_v38, 30  ;;  %v130_v5 = vshll.u32 %v129_v56, 23  ;;  %v335_v6 = vsub.s32 4294967266, %v330_v57 }
  0x6d   :  { %v913_v45 = vand.u32 31, %v911_v41  ;;  %v1403_v10 = vmin.u32 %v532_v40, %v1857_v42  ;;  %v1870_v11 = vshrl.u32 %v911_v41, 5  ;;  %v331_v19 = vsub.s32 32, %v330_v57 }
  0x6e   :  { %v755_v2 = vshll.u32 %v1859_v46, 30  ;;  %v336_v29 = vadd.s32 127, %v335_v6  ;;  %v131_v37 = vor.u32 4788187, %v130_v5  ;;  %v332_v38 = vshll.u32 %v1823_v39, %v330_v57 }
  0x6f   :  { %v914_v50 = vsub.s32 32, %v913_v45  ;;  %v925_v60 = vshll.u32 %v1572_v15, %v913_v45  ;;  %v919_v51 = vshll.u32 %v1576_v28, %v913_v45  ;;  %v928_v54 = vshll.u32 %v1573_v17, %v913_v45 }
  0x70   :  { %v1879_v63 = vsub.s32 %v752_v36, %v755_v2  ;;  %v922_v24 = vshll.u32 %v1577_v31, %v913_v45  ;;  %v916_v30 = vshll.u32 %v1575_v26, %v913_v45  ;;  %v534_v33 = vclz %v1403_v10 }
  0x71   :  { %v926_v16 = vshrl.u32 %v1573_v17, %v914_v50  ;;  %v929_v21 = vshrl.u32 %v1574_v22, %v914_v50  ;;  %v920_v12 = vshrl.u32 %v1577_v31, %v914_v50  ;;  %v923_v27 = vshrl.u32 %v1572_v15, %v914_v50 }
  0x72   :  { %v917_v55 = vshrl.u32 %v1576_v28, %v914_v50  ;;  %vm934_vm11 = vcmp.lt.s32.totalorder %v1870_v11, 4  ;;  %v127_v36 = vor.u32 %v126_v4, %v125_v3  ;;  %v1109_v61 = vand.u32 2139095040, %v1877_v23 }
  0x73   :  { %v930_v32 = vor.u32 %v929_v21, %v928_v54  ;;  %v927_v7 = vor.u32 %v926_v16, %v925_v60  ;;  %v333_v41 = vshrl.u32 %v315_v52, %v331_v19  ;;  %v758_v49 = vsub.s32 0, %v1879_v63 }
  0x74   :  { %v921_v45 = vor.u32 %v920_v12, %v919_v51  ;;  %v924_v53 = vor.u32 %v923_v27, %v922_v24  ;;  %v918_v56 = vor.u32 %v917_v55, %v916_v30  ;;  %vm931_vm12 = vcmp.lt.s32.totalorder %v1870_v11, 1 }
  0x75   :  { %vm933_vm13 = vcmp.lt.s32.totalorder %v1870_v11, 3  ;;  %v944_v40 = vsel %vm934_vm11, %v930_v32, 1326507024  ;;  %v337_v2 = vshll.u32 %v336_v29, 23  ;;  %v1404_v3 = vadd.s32 4294967294, %v534_v33 }
  0x76   :  { %v907_v4 = vor.u32 8388608, %v906_v34  ;;  %v940_v39 = vsel %vm934_vm11, %v927_v7, 920167782  ;;  %v132_v57 = vand.u32 2147483647, %v131_v37  ;;  %v134_v52 = vcvt.s32.f32 %v127_v36 }
  0x77   :  { %v1110_v5 = vshrl.u32 %v1109_v61, 23  ;;  %v915_v6 = vshrl.u32 %v1575_v26, %v914_v50  ;;  %vm932_vm14 = vcmp.lt.s32.totalorder %v1870_v11, 2  ;;  %v943_v10 = vsel %vm931_vm12, %v921_v45, %v924_v53 }
  0x78   :  { %v945_v60 = vsel %vm933_vm13, %v927_v7, %v944_v40  ;;  %v1411_v16 = vmin.u32 %v758_v49, %v1879_v63  ;;  %v936_v19 = vsel %vm934_vm11, %v924_v53, 2102212464  ;;  %v939_v51 = vsel %vm931_vm12, %v918_v56, %v921_v45 }
  0x79   :  { %v941_v54 = vsel %vm933_vm13, %v924_v53, %v940_v39  ;;  %v334_v50 = vor.u32 %v333_v41, %v332_v38  ;;  %v338_v21 = vor.u32 4788187, %v337_v2  ;;  %vm1405_vm15 = vcmp.lt.s32.totalorder %v1404_v3, 0 }
  0x7a   :  { %v947_v12 = vshll.u32 %v907_v4, 8  ;;  %v946_v24 = vsel %vm932_vm14, %v943_v10, %v945_v60  ;;  %v935_v27 = vsel %vm931_vm12, %v915_v6, %v918_v56  ;;  %v937_v29 = vsel %vm933_vm13, %v921_v45, %v936_v19 }
  0x7b   :  { %v942_v30 = vsel %vm932_vm14, %v939_v51, %v941_v54  ;;  %v1919_v55 = vmul.f32 %v134_v52, %v132_v57  ;;  %v1921_v32 = vsel %vm1405_vm15, 0, %v1404_v3  ;;  %v760_v33 = vclz %v1411_v16 }
  0x7c   :  { %v1426_v34 = vadd.s32 4294967169, %v1110_v5  ;;  %v339_v7 = vand.u32 2147483647, %v338_v21  ;;  %v341_v36 = vcvt.s32.f32 %v334_v50  ;;  %v938_v61 = vsel %vm932_vm14, %v935_v27, %v937_v29 }
  0x7d   :  { %v1923_v37 = vmul.u32.u64.low %v947_v12, %v946_v24  ;;  %v1924_v38 = vmul.u32.u64.high %v947_v12, %v946_v24, %v1923_v37  ;;  %v1928_v41 = vmul.u32.u64.low %v947_v12, %v942_v30  ;;  %v1929_v49 = vmul.u32.u64.high %v947_v12, %v942_v30, %v1928_v41 }
  0x7e   :  { %v1116_v45 = vadd.s32 1, %v1426_v34  ;;  %v522_v53 = vadd.s32 %v1787_v58, %v1792_v62  ;;  %v538_v56 = vsub.s32 32, %v1921_v32  ;;  %v542_v40 = vsub.s32 4294967266, %v1921_v32 }
  0x7f   :  { %v1106_v2 = vand.u32 2147483647, %v1877_v23  ;;  %v1412_v3 = vadd.s32 4294967294, %v760_v33  ;;  %v138_v4 = vsub.s32 4, %v1767_v35  ;;  %v954_v11 = vmul.u32 %v947_v12, %v938_v61 }
  0x80   :  { %vm1117_vm0 = vcmp.gt.s32.totalorder %v1116_v45, 0  ;;  %vm956_vm1 = vc.u32 %v1924_v38, %v1928_v41  ;;  %v136_v57 = vxor.u32 2147483648, %v1919_v55  ;;  %v1941_v52 = vmul.f32 %v341_v36, %v339_v7 }
  0x81   :  { %v1118_v39 = vsel %vm1117_vm0, %v1116_v45, 0  ;;  %v957_v58 = vadd.s32 1, %v1929_v49  ;;  %v539_v5 = vshll.u32 %v1857_v42, %v1921_v32  ;;  %v540_v6 = vshrl.u32 %v522_v53, %v538_v56 }
  0x82   :  { %v1120_v62 = vand.u32 31, %v1118_v39  ;;  %v543_v10 = vadd.s32 127, %v542_v40  ;;  %v1113_v60 = vand.u32 8388607, %v1106_v2  ;;  %vm1413_vm2 = vcmp.lt.s32.totalorder %v1412_v3, 0 }
  0x83   :  { %v958_v16 = vsel %vm956_vm1, %v957_v58, %v1929_v49  ;;  %v748_v42 = vadd.s32 %v1843_v9, %v1841_v8  ;;  %v1119_v24 = vshrl.u32 %v1118_v39, 5  ;;  %v1958_v30 = vsel %vm1413_vm2, 0, %v1412_v3 }
  0x84   :  { %v1121_v19 = vsub.s32 32, %v1120_v62  ;;  %v1123_v51 = vshll.u32 %v1575_v26, %v1120_v62  ;;  %v959_v54 = vadd.s32 %v958_v16, %v954_v11  ;;  %v1126_v50 = vshll.u32 %v1576_v28, %v1120_v62 }
  0x85   :  { %v1129_v21 = vshll.u32 %v1577_v31, %v1120_v62  ;;  %v1132_v12 = vshll.u32 %v1572_v15, %v1120_v62  ;;  %v1114_v7 = vor.u32 8388608, %v1113_v60  ;;  %v1135_v61 = vshll.u32 %v1573_v17, %v1120_v62 }
  0x86   :  { %v1124_v27 = vshrl.u32 %v1576_v28, %v1121_v19  ;;  %v1127_v29 = vshrl.u32 %v1577_v31, %v1121_v19  ;;  %v960_v32 = vadd.s32 536870912, %v959_v54  ;;  %v1130_v33 = vshrl.u32 %v1572_v15, %v1121_v19 }
  0x87   :  { %v1133_v34 = vshrl.u32 %v1573_v17, %v1121_v19  ;;  %v544_v49 = vshll.u32 %v543_v10, 23  ;;  %v768_v28 = vsub.s32 4294967266, %v1958_v30  ;;  %v1136_v31 = vshrl.u32 %v1574_v22, %v1121_v19 }
  0x88   :  { %v1125_v36 = vor.u32 %v1124_v27, %v1123_v51  ;;  %v1128_v37 = vor.u32 %v1127_v29, %v1126_v50  ;;  %v1963_v45 = vshrl.u32 %v960_v32, 30  ;;  %v1131_v8 = vor.u32 %v1130_v33, %v1129_v21 }
  0x89   :  { %v1134_v9 = vor.u32 %v1133_v34, %v1132_v12  ;;  %vm1138_vm4 = vcmp.lt.s32.totalorder %v1119_v24, 1  ;;  %vm1140_vm5 = vcmp.lt.s32.totalorder %v1119_v24, 3  ;;  %vm1969_vm6 = vcmp.le.f32.partialorder %v52_v14, 0.7853982 }
  0x8a   :  { %v962_v53 = vshll.u32 %v1963_v45, 30  ;;  %v1122_v17 = vshrl.u32 %v1575_v26, %v1121_v19  ;;  %vm1139_vm7 = vcmp.lt.s32.totalorder %v1119_v24, 2  ;;  %vm1141_vm8 = vcmp.lt.s32.totalorder %v1119_v24, 4 }
  0x8b   :  { %v1137_v56 = vor.u32 %v1136_v31, %v1135_v61  ;;  %v1146_v40 = vsel %vm1138_vm4, %v1125_v36, %v1128_v37  ;;  %v1147_v3 = vsel %vm1141_vm8, %v1134_v9, 920167782  ;;  %v1154_v22 = vshll.u32 %v1114_v7, 8 }
  0x8c   :  { %v541_v11 = vor.u32 %v540_v6, %v539_v5  ;;  %v1977_v39 = vsub.s32 %v959_v54, %v962_v53  ;;  %v1143_v14 = vsel %vm1141_vm8, %v1131_v8, 2102212464  ;;  %v1148_v58 = vsel %vm1140_vm5, %v1131_v8, %v1147_v3 }
  0x8d   :  { %v545_v62 = vor.u32 4788187, %v544_v49  ;;  %v764_v10 = vsub.s32 32, %v1958_v30  ;;  %v769_v60 = vadd.s32 127, %v768_v28  ;;  %v1149_v26 = vsel %vm1139_vm7, %v1146_v40, %v1148_v58 }
  0x8e   :  { %v965_v16 = vsub.s32 0, %v1977_v39  ;;  %v1142_v19 = vsel %vm1138_vm4, %v1122_v17, %v1125_v36  ;;  %v1150_v51 = vsel %vm1138_vm4, %v1128_v37, %v1131_v8  ;;  %v1151_v5 = vsel %vm1141_vm8, %v1137_v56, 1326507024 }
  0x8f   :  { %v1144_v6 = vsel %vm1140_vm5, %v1128_v37, %v1143_v14  ;;  %v1152_v54 = vsel %vm1140_vm5, %v1134_v9, %v1151_v5  ;;  %v1989_v50 = vmul.u32.u64.low %v1154_v22, %v1149_v26  ;;  %v1990_v21 = vmul.u32.u64.high %v1154_v22, %v1149_v26, %v1989_v50 }
  0x90   :  { %v137_v12 = vsel %vm54_vm3, %v136_v57, %v1919_v55  ;;  %v139_v27 = vsel %vm54_vm3, %v138_v4, %v1767_v35  ;;  %v345_v29 = vsub.s32 4, %v1800_v48  ;;  %v1419_v32 = vmin.u32 %v965_v16, %v1977_v39 }
  0x91   :  { %v343_v33 = vxor.u32 2147483648, %v1941_v52  ;;  %v546_v34 = vand.u32 2147483647, %v545_v62  ;;  %v548_v7 = vcvt.s32.f32 %v541_v11  ;;  %v1153_v36 = vsel %vm1139_vm7, %v1150_v51, %v1152_v54 }
  0x92   :  { %v967_v37 = vclz %v1419_v32  ;;  %v1145_v61 = vsel %vm1139_vm7, %v1142_v19, %v1144_v6  ;;  %v2006_v55 = vmul.u32.u64.low %v1154_v22, %v1153_v36  ;;  %v2007_v57 = vmul.u32.u64.high %v1154_v22, %v1153_v36, %v2006_v55 }
  0x93   :  { %vm261_vm9 = vcmp.lt.s32.totalorder %v1620_v1, 0  ;;  %v765_v35 = vshll.u32 %v1879_v63, %v1958_v30  ;;  %v766_v4 = vshrl.u32 %v748_v42, %v764_v10  ;;  %v770_v49 = vshll.u32 %v769_v60, 23 }
  0x94   :  { %vm2014_vm10 = vcmp.le.f32.partialorder %v259_v47, 0.7853982  ;;  %v1420_v9 = vadd.s32 4294967294, %v967_v37  ;;  %v1164_v24 = vadd.s32 1, %v1990_v21  ;;  %v140_v28 = vsel %vm1969_vm6, %v1618_v0, %v137_v12 }
  0x95   :  { %v141_v31 = vsel %vm1969_vm6, 0, %v139_v27  ;;  %v346_v63 = vsel %vm261_vm9, %v345_v29, %v1800_v48  ;;  %v1161_v42 = vmul.u32 %v1154_v22, %v1145_v61  ;;  %v344_v30 = vsel %vm261_vm9, %v343_v33, %v1941_v52 }
  0x96   :  { %v549_v53 = vmul.f32 %v548_v7, %v546_v34  ;;  %v955_v47 = vadd.s32 %v1928_v41, %v1924_v38  ;;  %vm1421_vm11 = vcmp.lt.s32.totalorder %v1420_v9, 0  ;;  %v767_v17 = vor.u32 %v766_v4, %v765_v35 }
  0x97   :  { %v771_v56 = vor.u32 4788187, %v770_v49  ;;  %v970_v40 = vsel %vm1421_vm11, 0, %v1420_v9  ;;  %vm1163_vm12 = vc.u32 %v2007_v57, %v1989_v50  ;;  %1469 = vcosq.f32 %v140_v28 }
  0x98   :  { %v971_v3 = vsub.s32 32, %v970_v40  ;;  %v972_v15 = vshll.u32 %v1977_v39, %v970_v40  ;;  %v975_v11 = vsub.s32 4294967266, %v970_v40  ;;  %v1165_v48 = vsel %vm1163_vm12, %v1164_v24, %v1990_v21 }
  0x99   :  { %v248_v22 = vadd.s32 3, %v141_v31  ;;  %v347_v52 = vsel %vm2014_vm10, %v1620_v1, %v344_v30  ;;  %v1166_v38 = vadd.s32 %v1165_v48, %v1161_v42  ;;  %1471 = vsinq.f32 %v140_v28 }
  0x9a   :  { %v348_v41 = vsel %vm2014_vm10, 0, %v346_v63  ;;  %v973_v14 = vshrl.u32 %v955_v47, %v971_v3  ;;  %v976_v58 = vadd.s32 127, %v975_v11  ;;  %v552_v62 = vsub.s32 4, %v1852_v25  ;;  %v2087_v47 = vld [vmem:[#allocation2 + $0x20] sm:$0xff] }
  0x9b   :  { %v772_v10 = vand.u32 2147483647, %v771_v56  ;;  %v774_v39 = vcvt.s32.f32 %v767_v17  ;;  %v1167_v60 = vadd.s32 536870912, %v1166_v38  ;;  %1473 = vcosq.f32 %v347_v52 }
  0x9c   :  { %v550_v26 = vxor.u32 2147483648, %v549_v53  ;;  %v974_v16 = vor.u32 %v973_v14, %v972_v15  ;;  %v977_v19 = vshll.u32 %v976_v58, 23  ;;  %1475 = vsinq.f32 %v347_v52 }
  0x9d   :  { %vm468_vm13 = vcmp.lt.s32.totalorder %v1624_v13, 0  ;;  %v2039_v1 = vshrl.u32 %v1167_v60, 30  ;;  %v455_v51 = vadd.s32 3, %v348_v41  ;;  %v2041_v54 = vand.u32 3, %v141_v31 }
  0x9e   :  { %v978_v5 = vor.u32 4788187, %v977_v19  ;;  %v981_v6 = vcvt.s32.f32 %v974_v16  ;;  %v553_v21 = vsel %vm468_vm13, %v552_v62, %v1852_v25  ;;  %v775_v12 = vmul.f32 %v774_v39, %v772_v10 }
  0x9f   :  { %v1169_v27 = vshll.u32 %v2039_v1, 30  ;;  %v2045_v29 = vand.u32 3, %v248_v22  ;;  %vm467_vm14 = vcmp.le.f32.partialorder %v466_v44, 0.7853982  ;;  %v551_v32 = vsel %vm468_vm13, %v550_v26, %v549_v53 }
  0xa0   :  { %v979_v33 = vand.u32 2147483647, %v978_v5  ;;  %v2049_v34 = vand.u32 3, %v348_v41  ;;  %vm694_vm15 = vcmp.lt.s32.totalorder %v1690_v18, 0  ;;  %v2054_v36 = vand.u32 3, %v455_v51 }
  0xa1   :  { %v2052_v7 = vsub.s32 %v1166_v38, %v1169_v27  ;;  %v555_v37 = vsel %vm467_vm14, 0, %v553_v21  ;;  %vm2058_vm0 = vcmp.le.f32.partialorder %v692_v20, 0.7853982  ;;  %v1470_v55 = vpop.eup %1469  ;;  %vm147_vm1 = vcmp.eq.s32.totalorder %v2041_v54, 0 }
  0xa2   :  { %v982_v61 = vmul.f32 %v981_v6, %v979_v33  ;;  %v554_v44 = vsel %vm467_vm14, %v1624_v13, %v551_v32  ;;  %v776_v35 = vxor.u32 2147483648, %v775_v12  ;;  %vm150_vm2 = vcmp.eq.s32.totalorder %v2041_v54, 2 }
  0xa3   :  { %v1172_v4 = vsub.s32 0, %v2052_v7  ;;  %v1472_v49 = vpop.eup %1471  ;;  %vm250_vm3 = vcmp.lt.s32.totalorder %v2045_v29, 2  ;;  %vm251_vm4 = vcmp.eq.s32.totalorder %v2045_v29, 0  ;;  %vm254_vm5 = vcmp.eq.s32.totalorder %v2045_v29, 2 }
  0xa4   :  { %vm357_vm6 = vcmp.eq.s32.totalorder %v2049_v34, 2  ;;  %v662_v20 = vadd.s32 3, %v555_v37  ;;  %v983_v8 = vxor.u32 2147483648, %v982_v61  ;;  %v151_v13 = vxor.u32 2147483648, %v1470_v55 }
  0xa5   :  { %v1427_v9 = vmin.u32 %v1172_v4, %v2052_v7  ;;  %v1474_v24 = vpop.eup %1473  ;;  %vm354_vm7 = vcmp.eq.s32.totalorder %v2049_v34, 0  ;;  %vm457_vm8 = vcmp.lt.s32.totalorder %v2054_v36, 2  ;;  %1477 = vcosq.f32 %v554_v44 }
  0xa6   :  { %vm901_vm9 = vcmp.lt.s32.totalorder %v1833_v43, 0  ;;  %v1476_v28 = vpop.eup %1475  ;;  %v148_v31 = vxor.u32 2147483648, %v1472_v49  ;;  %1479 = vsinq.f32 %v554_v44  ;;  %v777_v63 = vsel %vm694_vm15, %v776_v35, %v775_v12 }
  0xa7   :  { %v1174_v42 = vclz %v1427_v9  ;;  %vm458_vm12 = vcmp.eq.s32.totalorder %v2054_v36, 0  ;;  %vm461_vm13 = vcmp.eq.s32.totalorder %v2054_v36, 2  ;;  %v778_v30 = vsub.s32 4, %v1859_v46 }
  0xa8   :  { %vm2083_vm14 = vcmp.le.f32.partialorder %v899_v59, 0.7853982  ;;  %vm353_vm11 = vcmp.lt.s32.totalorder %v2049_v34, 2  ;;  %v2091_v17 = vand.u32 3, %v555_v37  ;;  %v2093_v56 = vand.u32 3, %v662_v20 }
  0xa9   :  { %v984_v40 = vsel %vm901_vm9, %v983_v8, %v982_v61  ;;  %v1428_v3 = vadd.s32 4294967294, %v1174_v42  ;;  %v152_v59 = vsel %vm150_vm2, %v151_v13, %v1472_v49  ;;  %v355_v15 = vxor.u32 2147483648, %v1476_v28 }
  0xaa   :  { %v358_v11 = vxor.u32 2147483648, %v1474_v24  ;;  %v780_v48 = vsel %vm2058_vm0, %v1690_v18, %v777_v63  ;;  %v253_v22 = vsel %vm251_vm4, %v1470_v55, %v148_v31  ;;  %v256_v52 = vsel %vm254_vm5, %v151_v13, %v1472_v49 }
  0xab   :  { %v1162_v38 = vadd.s32 %v1989_v50, %v2007_v57  ;;  %vm1429_vm10 = vcmp.lt.s32.totalorder %v1428_v3, 0  ;;  %v779_v41 = vsel %vm694_vm15, %v778_v30, %v1859_v46  ;;  %v985_v14 = vsub.s32 4, %v1963_v45 }
  0xac   :  { %v987_v58 = vsel %vm2083_vm14, %v1833_v43, %v984_v40  ;;  %v1177_v62 = vsel %vm1429_vm10, 0, %v1428_v3  ;;  %1481 = vcosq.f32 %v780_v48  ;;  %v149_v50 = vsel %vm147_vm1, %v1470_v55, %v148_v31  ;;  %v1494_v55 = vld [vmem:[#allocation2 + $0x28] sm:$0xff] }
  0xad   :  { %v1178_v10 = vsub.s32 32, %v1177_v62  ;;  %v1179_v39 = vshll.u32 %v2052_v7, %v1177_v62  ;;  %v1182_v60 = vsub.s32 4294967266, %v1177_v62  ;;  %v460_v57 = vsel %vm458_vm12, %v1474_v24, %v355_v15 }
  0xae   :  { %v463_v18 = vsel %vm461_vm13, %v358_v11, %v1476_v28  ;;  %1483 = vsinq.f32 %v780_v48  ;;  %v257_v46 = vsel %vm250_vm3, %v253_v22, %v256_v52  ;;  %v359_v51 = vsel %vm357_vm6, %v358_v11, %v1476_v28 }
  0xaf   :  { %1485 = vcosq.f32 %v987_v58  ;;  %v1180_v26 = vshrl.u32 %v1162_v38, %v1178_v10  ;;  %v1183_v16 = vadd.s32 127, %v1182_v60  ;;  %v1478_v19 = vpop.eup %1477  ;;  %vm560_vm15 = vcmp.lt.s32.totalorder %v2091_v17, 2  ;;  %v1495_v38 = vld [vmem:[#allocation5 + $0x18] sm:$0xff] }
  0xb0   :  { %v781_v5 = vsel %vm2058_vm0, 0, %v779_v41  ;;  %v986_v6 = vsel %vm901_vm9, %v985_v14, %v1963_v45  ;;  %1487 = vsinq.f32 %v987_v58  ;;  %v1480_v21 = vpop.eup %1479  ;;  %v356_v12 = vsel %vm354_vm7, %v1474_v24, %v355_v15 }
  0xb1   :  { %v464_v27 = vsel %vm457_vm8, %v460_v57, %v463_v18  ;;  %v1181_v29 = vor.u32 %v1180_v26, %v1179_v39  ;;  %v1184_v32 = vshll.u32 %v1183_v16, 23  ;;  %vm2259_vm1 = vcmp.lt.s32.totalorder %v2041_v54, 2 }
  0xb2   :  { %v153_v33 = vsel %vm2259_vm1, %v149_v50, %v152_v59  ;;  %vm2260_vm2 = vweird.f32 %v1618_v0  ;;  %vm561_vm0 = vcmp.eq.s32.totalorder %v2091_v17, 0  ;;  %vm564_vm3 = vcmp.eq.s32.totalorder %v2091_v17, 2 }
  0xb3   :  { %v2140_v7 = vsel %vm2260_vm2, nan, %v257_v46  ;;  %v888_v45 = vadd.s32 3, %v781_v5  ;;  %v988_v37 = vsel %vm2083_vm14, 0, %v986_v6  ;;  %v1185_v25 = vor.u32 4788187, %v1184_v32  ;;  %vm2262_vm8 = vmmov %vm2260_vm2 }
  0xb4   :  { %v1188_v36 = vcvt.s32.f32 %v1181_v29  ;;  %v360_v61 = vsel %vm353_vm11, %v356_v12, %v359_v51  ;;  %vm2261_vm4 = vweird.f32 %v2087_v47  ;;  %vm558_vm5 = vweird.f32 %v1494_v55 }
  0xb5   :  { %v2150_v54 = vsel %vm2261_vm4, nan, %v464_v27  ;;  %v562_v44 = vxor.u32 2147483648, %v1480_v21  ;;  %v565_v35 = vxor.u32 2147483648, %v1478_v19  ;;  %vm664_vm6 = vcmp.lt.s32.totalorder %v2093_v56, 2  ;;  %vm2263_vm10 = vmmov %vm2261_vm4 }
  0xb6   :  { %vm665_vm7 = vcmp.eq.s32.totalorder %v2093_v56, 0  ;;  %v1186_v4 = vand.u32 2147483647, %v1185_v25  ;;  %v1192_v49 = vsub.s32 4, %v2039_v1  ;;  %v2157_v20 = vsel %vm2262_vm8, nan, %v153_v33  ;;  %v1482_v9 = vpop.eup %1481 }
  0xb7   :  { %vm668_vm9 = vcmp.eq.s32.totalorder %v2093_v56, 2  ;;  %v785_v34 = vand.u32 3, %v781_v5  ;;  %v1095_v8 = vadd.s32 3, %v988_v37  ;;  %v2162_v24 = vsel %vm2263_vm10, nan, %v360_v61 }
  0xb8   :  { %v2166_v13 = vmul.f32 %v2150_v54, %v2140_v7  ;;  %v889_v28 = vand.u32 3, %v888_v45  ;;  %v1189_v31 = vmul.f32 %v1188_v36, %v1186_v4  ;;  %v1484_v63 = vpop.eup %1483  ;;  %v563_v0 = vsel %vm561_vm0, %v1478_v19, %v562_v44 }
  0xb9   :  { %v566_v42 = vsel %vm564_vm3, %v565_v35, %v1480_v21  ;;  %vm2174_vm11 = vcmp.le.f32.partialorder %v1106_v2, 0.7853982  ;;  %vm1108_vm12 = vcmp.lt.s32.totalorder %v1877_v23, 0  ;;  %v1486_v53 = vpop.eup %1485  ;;  %v667_v47 = vsel %vm665_vm7, %v1478_v19, %v562_v44 }
  0xba   :  { %v670_v40 = vsel %vm668_vm9, %v565_v35, %v1480_v21  ;;  %v1190_v3 = vxor.u32 2147483648, %v1189_v31  ;;  %v1193_v59 = vsel %vm1108_vm12, %v1192_v49, %v2039_v1  ;;  %v1488_v15 = vpop.eup %1487  ;;  %v2184_v11 = vmul.f32 %v2150_v54, %v2157_v20 }
  0xbb   :  { %vm787_vm13 = vcmp.eq.s32.totalorder %v785_v34, 0  ;;  %vm790_vm14 = vcmp.eq.s32.totalorder %v785_v34, 2  ;;  %v1096_v2 = vand.u32 3, %v1095_v8  ;;  %v567_v48 = vsel %vm560_vm15, %v563_v0, %v566_v42 }
  0xbc   :  { %vm891_vm1 = vcmp.eq.s32.totalorder %v889_v28, 0  ;;  %vm894_vm2 = vcmp.eq.s32.totalorder %v889_v28, 2  ;;  %v1191_v22 = vsel %vm1108_vm12, %v1190_v3, %v1189_v31  ;;  %v671_v52 = vsel %vm664_vm6, %v667_v47, %v670_v40 }
  0xbd   :  { %vm784_vm0 = vweird.f32 %v1495_v38  ;;  %v791_v1 = vxor.u32 2147483648, %v1482_v9  ;;  %v1194_v41 = vsel %vm2174_vm11, %v1877_v23, %v1191_v22  ;;  %v1195_v14 = vsel %vm2174_vm11, 0, %v1193_v59 }
  0xbe   :  { %v788_v58 = vxor.u32 2147483648, %v1484_v63  ;;  %v995_v62 = vxor.u32 2147483648, %v1488_v15  ;;  %v998_v17 = vxor.u32 2147483648, %v1486_v53  ;;  %1489 = vcosq.f32 %v1194_v41 }
  0xbf   :  { %v992_v10 = vand.u32 3, %v988_v37  ;;  %vm1098_vm15 = vcmp.eq.s32.totalorder %v1096_v2, 0  ;;  %vm1101_vm3 = vcmp.eq.s32.totalorder %v1096_v2, 2  ;;  %1491 = vsinq.f32 %v1194_v41 }
  0xc0   :  { %v568_v56 = vsel %vm558_vm5, nan, %v567_v48  ;;  %vm786_vm4 = vcmp.lt.s32.totalorder %v785_v34, 2  ;;  %vm890_vm6 = vcmp.lt.s32.totalorder %v889_v28, 2  ;;  %v1302_v39 = vadd.s32 3, %v1195_v14 }
  0xc1   :  { %v672_v60 = vsel %vm558_vm5, nan, %v671_v52  ;;  %v789_v50 = vsel %vm787_vm13, %v1482_v9, %v788_v58  ;;  %v792_v57 = vsel %vm790_vm14, %v791_v1, %v1484_v63  ;;  %vm1097_vm7 = vcmp.lt.s32.totalorder %v1096_v2, 2 }
  0xc2   :  { %v893_v18 = vsel %vm891_vm1, %v1482_v9, %v788_v58  ;;  %v896_v46 = vsel %vm894_vm2, %v791_v1, %v1484_v63  ;;  %v1100_v26 = vsel %vm1098_vm15, %v1486_v53, %v995_v62  ;;  %v1103_v16 = vsel %vm1101_vm3, %v998_v17, %v1488_v15 }
  0xc3   :  { %vm991_vm8 = vweird.f32 %v1833_v43  ;;  %vm994_vm9 = vcmp.eq.s32.totalorder %v992_v10, 0  ;;  %vm997_vm10 = vcmp.eq.s32.totalorder %v992_v10, 2  ;;  %vm1198_vm11 = vweird.f32 %v1877_v23 }
  0xc4   :  { %v675_v19 = vmul.f32 %v568_v56, %v2162_v24  ;;  %v793_v51 = vsel %vm786_vm4, %v789_v50, %v792_v57  ;;  %v1199_v5 = vand.u32 3, %v1195_v14  ;;  %v1303_v6 = vand.u32 3, %v1302_v39 }
  0xc5   :  { %v676_v21 = vmul.f32 %v2166_v13, %v568_v56  ;;  %v677_v12 = vmul.f32 %v672_v60, %v2157_v20  ;;  %v897_v27 = vsel %vm890_vm6, %v893_v18, %v896_v46  ;;  %v1104_v29 = vsel %vm1097_vm7, %v1100_v26, %v1103_v16 }
  0xc6   :  { %v679_v32 = vmul.f32 %v2184_v11, %v568_v56  ;;  %vm993_vm5 = vcmp.lt.s32.totalorder %v992_v10, 2  ;;  %v996_v33 = vsel %vm994_vm9, %v1486_v53, %v995_v62  ;;  %v999_v45 = vsel %vm997_vm10, %v998_v17, %v1488_v15 }
  0xc7   :  { %v680_v37 = vmul.f32 %v672_v60, %v2140_v7  ;;  %v682_v25 = vmul.f32 %v672_v60, %v2162_v24  ;;  %v683_v36 = vmul.f32 %v2166_v13, %v672_v60  ;;  %v794_v61 = vsel %vm784_vm0, nan, %v793_v51 }
  0xc8   :  { %v1490_v55 = vpop.eup %1489  ;;  %v898_v44 = vsel %vm784_vm0, nan, %v897_v27  ;;  %v2217_v35 = vsel %vm991_vm8, nan, %v1104_v29  ;;  %vm1204_vm12 = vcmp.eq.s32.totalorder %v1199_v5, 2  ;;  %vm1308_vm13 = vcmp.eq.s32.totalorder %v1303_v6, 2 }
  0xc9   :  { %v1492_v4 = vpop.eup %1491  ;;  %v1000_v49 = vsel %vm993_vm5, %v996_v33, %v999_v45  ;;  %vm1201_vm14 = vcmp.eq.s32.totalorder %v1199_v5, 0  ;;  %v1205_v34 = vxor.u32 2147483648, %v1490_v55  ;;  %vm1305_vm1 = vcmp.eq.s32.totalorder %v1303_v6, 0 }
  0xca   :  { %v684_v8 = vmul.f32 %v568_v56, %v2157_v20  ;;  %vm1200_vm2 = vcmp.lt.s32.totalorder %v1199_v5, 2  ;;  %v1202_v9 = vxor.u32 2147483648, %v1492_v4  ;;  %vm1304_vm15 = vcmp.lt.s32.totalorder %v1303_v6, 2 }
  0xcb   :  { %v1206_v13 = vsel %vm1204_vm12, %v1205_v34, %v1492_v4  ;;  %v1310_v28 = vsel %vm1308_vm13, %v1205_v34, %v1492_v4  ;;  %v1313_v31 = vmul.f32 %v2217_v35, %v898_v44  ;;  %v1314_v63 = vmul.f32 %v2217_v35, %v794_v61  ;;  %v40_v4 = vld [vmem:[#allocation2] sm:$0xff] }
  0xcc   :  { %v678_v0 = vsub.f32 %v676_v21, %v677_v12  ;;  %v1001_v42 = vsel %vm991_vm8, nan, %v1000_v49  ;;  %v1203_v30 = vsel %vm1201_vm14, %v1490_v55, %v1202_v9  ;;  %v1307_v53 = vsel %vm1305_vm1, %v1490_v55, %v1202_v9  ;;  %v46_v49 = vld [vmem:[#allocation5] sm:$0xff]  ;;  %v41_v9 = vld [vmem:[#allocation2 + $0x8] sm:$0xff] }
  0xcd   :  { %v686_v47 = vmul.f32 %v2184_v11, %v672_v60  ;;  %v687_v40 = vmul.f32 %v568_v56, %v2140_v7  ;;  %v1207_v3 = vsel %vm1200_vm2, %v1203_v30, %v1206_v13  ;;  %v1311_v59 = vsel %vm1304_vm15, %v1307_v53, %v1310_v28 }
  0xce   :  { %v681_v15 = vadd.f32 %v680_v37, %v679_v32  ;;  %v685_v2 = vadd.f32 %v684_v8, %v683_v36  ;;  %v1208_v48 = vsel %vm1198_vm11, nan, %v1207_v3  ;;  %v1312_v22 = vsel %vm1198_vm11, nan, %v1311_v59 }
  0xcf   :  { %v1315_v52 = vmul.f32 %v1208_v48, %v1001_v42  ;;  %v1316_v38 = vmul.f32 %v1313_v31, %v1208_v48  ;;  %v1317_v43 = vmul.f32 %v1312_v22, %v794_v61  ;;  %v1319_v1 = vmul.f32 %v1314_v63, %v1208_v48 }
  0xd0   :  { %v1320_v41 = vmul.f32 %v1312_v22, %v898_v44  ;;  %v1322_v14 = vmul.f32 %v1312_v22, %v1001_v42  ;;  %v1323_v58 = vmul.f32 %v1313_v31, %v1312_v22  ;;  %v1324_v11 = vmul.f32 %v1208_v48, %v794_v61 }
  0xd1   :  { %v1318_v62 = vsub.f32 %v1316_v38, %v1317_v43  ;;  %v1326_v17 = vmul.f32 %v1314_v63, %v1312_v22  ;;  %v1327_v10 = vmul.f32 %v1208_v48, %v898_v44  ;;  %v1332_v56 = vsub.f32 %v675_v19, %v1315_v52  ;;  %v42_v63 = vld [vmem:[#allocation2 + $0x10] sm:$0xff] }
  0xd2   :  { %v688_v39 = vsub.f32 %v686_v47, %v687_v40  ;;  %v1321_v60 = vadd.f32 %v1320_v41, %v1319_v1  ;;  %v1325_v50 = vadd.f32 %v1324_v11, %v1323_v58  ;;  %v1341_v23 = vsub.f32 %v682_v25, %v1322_v14 }
  0xd3   :  { %v1328_v57 = vsub.f32 %v1326_v17, %v1327_v10  ;;  %v1333_v18 = vmul.f32 %v1332_v56, %v1332_v56  ;;  %v1335_v46 = vsub.f32 %v678_v0, %v1318_v62  ;;  %v689_v16 = vsub.f32 0.0, %v2150_v54  ;;  %v48_v0 = vld [vmem:[#allocation5 + $0x10] sm:$0xff] }
  0xd4   :  { %v1338_v26 = vsub.f32 %v681_v15, %v1321_v60  ;;  %v1329_v51 = vsub.f32 0.0, %v2217_v35  ;;  %v1344_v6 = vsub.f32 %v685_v2, %v1325_v50  ;;  %v690_v21 = vmul.f32 %v2162_v24, %v2140_v7 }
  0xd5   :  { %v1336_v5 = vmul.f32 %v1335_v46, %v1335_v46  ;;  %v1330_v27 = vmul.f32 %v1001_v42, %v898_v44  ;;  %v1342_v29 = vmul.f32 %v1341_v23, %v1341_v23  ;;  %v1347_v32 = vsub.f32 %v688_v39, %v1328_v57  ;;  %v47_v44 = vld [vmem:[#allocation5 + $0x8] sm:$0xff] }
  0xd6   :  { %v1339_v12 = vmul.f32 %v1338_v26, %v1338_v26  ;;  %v691_v33 = vmul.f32 %v2162_v24, %v2157_v20  ;;  %v1331_v45 = vmul.f32 %v1001_v42, %v794_v61  ;;  %v1345_v25 = vmul.f32 %v1344_v6, %v1344_v6 }
  0xd7   :  { %v1337_v19 = vadd.f32 %v1336_v5, %v1333_v18  ;;  %v1350_v36 = vsub.f32 %v689_v16, %v1329_v51  ;;  %v1348_v55 = vmul.f32 %v1347_v32, %v1347_v32  ;;  %v1353_v35 = vsub.f32 %v690_v21, %v1330_v27 }
  0xd8   :  { %v1356_v7 = vsub.f32 %v691_v33, %v1331_v45  ;;  %v1359_v31 = vsub.f32 %v40_v4, %v46_v49  ;;  %v1362_v61 = vsub.f32 %v41_v9, %v47_v44  ;;  %v1365_v53 = vsub.f32 %v42_v63, %v48_v0 }
  0xd9   :  { %v1340_v37 = vadd.f32 %v1339_v12, %v1337_v19  ;;  %v1351_v8 = vmul.f32 %v1350_v36, %v1350_v36  ;;  %v1354_v28 = vmul.f32 %v1353_v35, %v1353_v35 }
  0xda   :  { %v1357_v24 = vmul.f32 %v1356_v7, %v1356_v7  ;;  %v1360_v30 = vmul.f32 %v1359_v31, %v1359_v31  ;;  %v1363_v40 = vmul.f32 %v1362_v61, %v1362_v61  ;;  %v1366_v59 = vmul.f32 %v1365_v53, %v1365_v53 }
  0xdb   :  { %v1343_v54 = vadd.f32 %v1342_v29, %v1340_v37 }
  0xdd   :  { %v1346_v34 = vadd.f32 %v1345_v25, %v1343_v54 }
  0xdf   :  { %v1349_v13 = vadd.f32 %v1348_v55, %v1346_v34 }
  0xe1   :  { %v1352_v20 = vadd.f32 %v1351_v8, %v1349_v13 }
  0xe3   :  { %v1355_v42 = vadd.f32 %v1354_v28, %v1352_v20 }
  0xe5   :  { %v1358_v47 = vadd.f32 %v1357_v24, %v1355_v42 }
  0xe7   :  { %v1361_v3 = vadd.f32 %v1360_v30, %v1358_v47 }
  0xe9   :  { %v1364_v15 = vadd.f32 %v1363_v40, %v1361_v3 }
  0xeb   :  { %v1367_v2 = vadd.f32 %v1366_v59, %v1364_v15 }
  0xed   :  { %1369 = vst [vmem:[#allocation7] sm:$0xff] %v1367_v2 }
  0xee   :  { %1551 = shalt.err (!%p1548_p6)
}
  0xef   :  { %s1552_s10 = scalar_lea.hbm %s2250_s2, 128 }
  0xf0   :  { %p1553_p7 = scmp.ne.s32.totalorder %s2250_s2, %s1552_s10  ;;  %p1556_p8 = scmp.lt.u32.totalorder %s1552_s10, %s2250_s2 }
  0xf2   :  { %p1558_p9 = pnand %p1556_p8, %p1553_p7 }
  0xf4   :  { %1561 = shalt.err (!%p1558_p9)
}
  0xf5   :  { %1379 = dma.vmem_to_hbm [thread:$0]  %s1377_s6, 128, %s2250_s2, [#allocation4]  }
  0xf6   :  { %1566 = dma.done.wait [#allocation4], 128  }
  0xf7   :  { %1567 = vsyncadd [#allocation4], 4294967168 }
  0xf8   :  { %1383 = vsyncpa [#allocation3], 1 }
  0xf9   :  { %1384 = vsyncpa [#allocation6], 1 }
  0xfa   :  { %1385 = vsyncpa [#allocation4], 1 }

</bundles_post_ra>
